<compile_context>
chip_gen: v5e
topology: v5e:2x2
jax: 0.10.0
libtpu: 0.0.40
codegen_flags: <defaults>
</compile_context>

<pallas_src>
import math
from functools import partial

import jax
import jax.numpy as jnp
from jax import lax
from jax.experimental import pallas as pl
from jax.experimental.pallas import tpu as pltpu


def _group_conv(win_ref, wg, g, *, stride, dilation, K, cin2, Tt):
    """One group's 1-D conv as a single fused MXU contraction.

    win_ref: VMEM scratch ref (C_in, Lwin) holding the (halo'd) input window.
    wg:      (cout2, K*cin2) folded, k-major weights for this group.
    Returns (cout2, Tt) f32 accumulator.
    """
    rows = slice(g * cin2, (g + 1) * cin2)
    if stride == 1:
        xw = win_ref[rows, :]                                    # single contiguous load
        slices = [xw[:, k * dilation:k * dilation + Tt] for k in range(K)]
    else:
        # Decimate once per distinct phase with a strided ref load, then unit-stride slices.
        qmax = {}
        for k in range(K):
            p = (k * dilation) % stride
            q = (k * dilation) // stride
            qmax[p] = max(qmax.get(p, 0), q)
        dec = {p: win_ref[rows, pl.ds(p, qm + Tt, stride=stride)] for p, qm in qmax.items()}
        slices = []
        for k in range(K):
            p = (k * dilation) % stride
            q = (k * dilation) // stride
            slices.append(dec[p][:, q:q + Tt])
    rhs = jnp.concatenate(slices, axis=0) if K > 1 else slices[0]   # (K*cin2, Tt), k-major
    return jnp.dot(wg, rhs, preferred_element_type=jnp.float32)


def _make_single_kernel(*, stride, dilation, K, cin2, cout2, Tt):
    def kernel(x_ref, w_ref, o_ref, win_scr):
        # x_ref: (1, C_in, T_pad)  w_ref: (2, cout2, K*cin2)  o_ref: (1, C_out, T_out)
        win_scr[...] = x_ref[0]
        for g in range(2):                                         # groups = 2
            acc = _group_conv(win_scr, w_ref[g], g, stride=stride, dilation=dilation,
                              K=K, cin2=cin2, Tt=Tt)
            o_ref[0, g * cout2:(g + 1) * cout2, :] = acc.astype(o_ref.dtype)
    return kernel


def _make_tiled_kernel(*, stride, dilation, K, cin2, cout2, Tt, halo, Tx_blk):
    def kernel(x_ref, xn_ref, w_ref, o_ref, win_scr):
        # x_ref / xn_ref: (1, C_in, Tx_blk) current / next time block of x
        # o_ref: (1, C_out, Tt)   win_scr: (C_in, Tx_blk + halo)
        win_scr[:, :Tx_blk] = x_ref[0]
        if halo:
            win_scr[:, Tx_blk:Tx_blk + halo] = xn_ref[0, :, :halo]
        for g in range(2):
            acc = _group_conv(win_scr, w_ref[g], g, stride=stride, dilation=dilation,
                              K=K, cin2=cin2, Tt=Tt)
            o_ref[0, g * cout2:(g + 1) * cout2, :] = acc.astype(o_ref.dtype)
    return kernel


def complex_conv1d(x, A, B, *, in_channels, stride=1, padding=0, dilation=1,
                   time_tile=512, compute_dtype=None):
    """Forward pass of ComplexConv1d.  x: (N, C_in, T).

    time_tile:     output-time tile (multiple of 128).  ~512 for v5e/v6e, ~256 for v7x (64 MiB VMEM).
    compute_dtype: optionally jnp.bfloat16 on v6e/v7x (MXU inputs; accumulation stays f32).
    """
    N, C_in, T = x.shape
    C_out, cin2, K = A.shape
    assert C_in == in_channels and cin2 == in_channels // 2 and C_out % 2 == 0
    cout2 = C_out // 2
    out_dtype = x.dtype

    # Reflect padding (wrapper-side; see TODO at top of file).
    if padding:
        x = jnp.pad(x, ((0, 0), (0, 0), (padding, padding)), mode="reflect")
    T_pad = T + 2 * padding
    halo = dilation * (K - 1)
    T_out = (T_pad - halo - 1) // stride + 1
    assert T_out >= 1

    # Fold weights: conv(x, A) + conv(x, Bw) == conv(x, A + Bw).
    spl = in_channels // 2
    Bw = jnp.concatenate([-B[:spl], B[spl:]], axis=0)        # quirky split, as in the PyTorch source
    W = A + Bw                                               # (C_out, cin2, K)
    # Per-group, k-major 2D slabs: Wg[g, o, k*cin2 + i] = W[g*cout2 + o, i, k]
    Wg = W.reshape(2, cout2, cin2, K).transpose(0, 1, 3, 2).reshape(2, cout2, K * cin2)

    if compute_dtype is not None:
        x = x.astype(compute_dtype)
        Wg = Wg.astype(compute_dtype)

    time_tile = max(128, (time_tile // 128) * 128)
    use_tiling = (T_out > time_tile) and (halo <= time_tile * stride)
    common = dict(stride=stride, dilation=dilation, K=K, cin2=cin2, cout2=cout2)
    vmem_limit = 32 * 1024 * 1024

    if not use_tiling:
        # Small-T path: one tile per sample, blocks cover full dims.
        Tt = T_out
        kernel = _make_single_kernel(Tt=Tt, **common)
        return pl.pallas_call(
            kernel,
            out_shape=jax.ShapeDtypeStruct((N, C_out, T_out), out_dtype),
            grid_spec=pltpu.PrefetchScalarGridSpec(
                num_scalar_prefetch=0,
                grid=(N,),
                in_specs=[
                    pl.BlockSpec((1, C_in, T_pad), lambda n: (n, 0, 0)),
                    pl.BlockSpec((2, cout2, K * cin2), lambda n: (0, 0, 0)),
                ],
                out_specs=pl.BlockSpec((1, C_out, T_out), lambda n: (n, 0, 0)),
                scratch_shapes=[pltpu.VMEM((C_in, T_pad), x.dtype)],
            ),
            compiler_params=pltpu.CompilerParams(
                dimension_semantics=("parallel",), vmem_limit_bytes=vmem_limit),
        )(x, Wg)

    # Time-tiled path.
    Tt = time_tile
    n_tiles = pl.cdiv(T_out, Tt)
    Tx_blk = Tt * stride
    # One extra zero block at the end so the "next block" (halo source) always exists.
    T_x_total = (n_tiles + 1) * Tx_blk
    x = jnp.pad(x, ((0, 0), (0, 0), (0, T_x_total - T_pad)))

    kernel = _make_tiled_kernel(Tt=Tt, halo=halo, Tx_blk=Tx_blk, **common)
    out = pl.pallas_call(
        kernel,
        out_shape=jax.ShapeDtypeStruct((N, C_out, n_tiles * Tt), out_dtype),
        grid_spec=pltpu.PrefetchScalarGridSpec(
            num_scalar_prefetch=0,
            grid=(N, n_tiles),
            in_specs=[
                pl.BlockSpec((1, C_in, Tx_blk), lambda n, t: (n, 0, t)),        # current block
                pl.BlockSpec((1, C_in, Tx_blk), lambda n, t: (n, 0, t + 1)),    # next block (halo)
                pl.BlockSpec((2, cout2, K * cin2), lambda n, t: (0, 0, 0)),     # resident weights
            ],
            out_specs=pl.BlockSpec((1, C_out, Tt), lambda n, t: (n, 0, t)),
            scratch_shapes=[pltpu.VMEM((C_in, Tx_blk + halo), x.dtype)],
        ),
        compiler_params=pltpu.CompilerParams(
            dimension_semantics=("parallel", "parallel"), vmem_limit_bytes=vmem_limit),
    )(x, x, Wg)

    if n_tiles * Tt != T_out:
        out = out[:, :, :T_out]
    return out


def _reference_forward(x, A, B, *, in_channels, stride, padding, dilation):
    """Pure-JAX reference mirroring the PyTorch forward (two convs, then add)."""
    if padding:
        x = jnp.pad(x, ((0, 0), (0, 0), (padding, padding)), mode="reflect")
    spl = in_channels // 2
    Bw = jnp.concatenate([-B[:spl], B[spl:]], axis=0)
    dn = lax.conv_dimension_numbers(x.shape, A.shape, ("NCH", "OIH", "NCH"))
    conv = partial(lax.conv_general_dilated, window_strides=(stride,), padding="VALID",
                   rhs_dilation=(dilation,), dimension_numbers=dn, feature_group_count=2)
    return conv(x, A) + conv(x, Bw)


if __name__ == "__main__":
    key = jax.random.PRNGKey(0)

    def make_params(k, in_ch, out_ch, K):
        kA, kB = jax.random.split(k)
        fan_in = (in_ch // 2) * K
        gain = math.sqrt(2.0)                       # calculate_gain('leaky_relu', 0)
        bound = math.sqrt(3.0) * gain / math.sqrt(fan_in)
        A = jax.random.uniform(kA, (out_ch, in_ch // 2, K), jnp.float32,
                               minval=-bound / math.pi ** 2, maxval=bound / math.pi ** 2)
        B = jax.random.uniform(kB, (out_ch, in_ch // 2, K), jnp.float32,
                               minval=-1.0 / math.pi, maxval=1.0 / math.pi)
        return A, B

    k1, k2, kx1, kx2 = jax.random.split(key, 4)

    # Test 1: small shapes, single-tile path.
    in_ch, out_ch, K = 4, 8, 3
    A, B = make_params(k1, in_ch, out_ch, K)
    x = jax.random.normal(kx1, (2, in_ch, 16), jnp.float32)
    out = complex_conv1d(x, A, B, in_channels=in_ch, stride=1, padding=2, dilation=1)
    out = jax.block_until_ready(out)
    ref = _reference_forward(x, A, B, in_channels=in_ch, stride=1, padding=2, dilation=1)
    assert out.shape == ref.shape, (out.shape, ref.shape)
    assert jnp.allclose(out, ref, atol=1e-5, rtol=1e-5), "mismatch (single-tile path)"

    # Test 2: longer sequence with dilation, exercises the time-tiled halo path.
    in_ch2, out_ch2, K2 = 8, 16, 3
    A2, B2 = make_params(k2, in_ch2, out_ch2, K2)
    x2 = jax.random.normal(kx2, (2, in_ch2, 300), jnp.float32)
    out2 = complex_conv1d(x2, A2, B2, in_channels=in_ch2, stride=1, padding=2,
                          dilation=2, time_tile=128)
    out2 = jax.block_until_ready(out2)
    ref2 = _reference_forward(x2, A2, B2, in_channels=in_ch2, stride=1, padding=2, dilation=2)
    assert out2.shape == ref2.shape, (out2.shape, ref2.shape)
    assert jnp.allclose(out2, ref2, atol=1e-4, rtol=1e-4), "mismatch (time-tiled path)"

    print("KERNEL_OK")
</pallas_src>

<mosaic_0001>
module attributes {stable_mosaic.version = 11 : i64} {
  func.func @kernel(%arg0: i32, %arg1: memref<1x4x20xf32, #tpu.memory_space<vmem>>, %arg2: memref<2x4x6xf32, #tpu.memory_space<vmem>>, %arg3: memref<1x8x18xf32, #tpu.memory_space<vmem>>, %arg4: memref<4x20xf32, #tpu.memory_space<vmem>>) attributes {dimension_semantics = [#tpu.dimension_semantics<parallel>], iteration_bounds = array<i64: 2>, scalar_prefetch = 0 : i64, scratch_operands = 1 : i64, tpu.core_type = #tpu.core_type<tc>, window_params = [{transform_indices = @transform_0, window_bounds = array<i64: 1, 4, 20>}, {pipeline_mode = #tpu.pipeline_mode<synchronous>, transform_indices = @transform_1, window_bounds = array<i64: 2, 4, 6>}, {transform_indices = @transform_2, window_bounds = array<i64: 1, 8, 18>}]} {
    %c0 = arith.constant 0 : index
    %c0_0 = arith.constant 0 : index
    %c0_1 = arith.constant 0 : index
    %0 = vector.load %arg1[%c0, %c0_0, %c0_1] : memref<1x4x20xf32, #tpu.memory_space<vmem>>, vector<1x4x20xf32>
    %1 = vector.shape_cast %0 : vector<1x4x20xf32> to vector<4x20xf32>
    %c0_2 = arith.constant 0 : index
    %c0_3 = arith.constant 0 : index
    %2 = vector.load %arg4[%c0_2, %c0_3] : memref<4x20xf32, #tpu.memory_space<vmem>>, vector<4x20xf32>
    tpu.vector_store %arg4[%c0_2, %c0_3], %1 {strides = array<i32>} : memref<4x20xf32, #tpu.memory_space<vmem>>, vector<4x20xf32>,
    %c0_4 = arith.constant 0 : index
    %c0_5 = arith.constant 0 : index
    %c0_6 = arith.constant 0 : index
    %3 = vector.load %arg2[%c0_4, %c0_5, %c0_6] : memref<2x4x6xf32, #tpu.memory_space<vmem>>, vector<1x4x6xf32>
    %4 = vector.shape_cast %3 : vector<1x4x6xf32> to vector<4x6xf32>
    %c0_7 = arith.constant 0 : index
    %c0_8 = arith.constant 0 : index
    %5 = vector.load %arg4[%c0_7, %c0_8] : memref<4x20xf32, #tpu.memory_space<vmem>>, vector<2x20xf32>
    %6 = vector.extract_strided_slice %5 {offsets = [0, 0], sizes = [2, 18], strides = [1, 1]} : vector<2x20xf32> to vector<2x18xf32>
    %7 = vector.extract_strided_slice %5 {offsets = [0, 1], sizes = [2, 18], strides = [1, 1]} : vector<2x20xf32> to vector<2x18xf32>
    %8 = vector.extract_strided_slice %5 {offsets = [0, 2], sizes = [2, 18], strides = [1, 1]} : vector<2x20xf32> to vector<2x18xf32>
    %9 = tpu.concatenate %6, %7, %8 in 0 : vector<2x18xf32>, vector<2x18xf32>, vector<2x18xf32> -> vector<6x18xf32>
    %cst = arith.constant dense<0.000000e+00> : vector<4x18xf32>
    %10 = tpu.matmul %4, %9, %cst {dimension_numbers = #tpu.dot_dimension_numbers<[1], [0], [0], [1], [0, 0, 1, 1], [], []>} : vector<4x6xf32>, vector<6x18xf32>, vector<4x18xf32> -> vector<4x18xf32>
    %c0_9 = arith.constant 0 : index
    %c0_10 = arith.constant 0 : index
    %c0_11 = arith.constant 0 : index
    %11 = vector.load %arg3[%c0_9, %c0_10, %c0_11] : memref<1x8x18xf32, #tpu.memory_space<vmem>>, vector<1x4x18xf32>
    %12 = vector.shape_cast %11 : vector<1x4x18xf32> to vector<4x18xf32>
    %13 = vector.shape_cast %10 : vector<4x18xf32> to vector<1x4x18xf32>
    tpu.vector_store %arg3[%c0_9, %c0_10, %c0_11], %13 {strides = array<i32>} : memref<1x8x18xf32, #tpu.memory_space<vmem>>, vector<1x4x18xf32>,
    %c1 = arith.constant 1 : index
    %c0_12 = arith.constant 0 : index
    %c0_13 = arith.constant 0 : index
    %14 = vector.load %arg2[%c1, %c0_12, %c0_13] : memref<2x4x6xf32, #tpu.memory_space<vmem>>, vector<1x4x6xf32>
    %15 = vector.shape_cast %14 : vector<1x4x6xf32> to vector<4x6xf32>
    %c2 = arith.constant 2 : index
    %c0_14 = arith.constant 0 : index
    %16 = vector.load %arg4[%c2, %c0_14] : memref<4x20xf32, #tpu.memory_space<vmem>>, vector<2x20xf32>
    %17 = vector.extract_strided_slice %16 {offsets = [0, 0], sizes = [2, 18], strides = [1, 1]} : vector<2x20xf32> to vector<2x18xf32>
    %18 = vector.extract_strided_slice %16 {offsets = [0, 1], sizes = [2, 18], strides = [1, 1]} : vector<2x20xf32> to vector<2x18xf32>
    %19 = vector.extract_strided_slice %16 {offsets = [0, 2], sizes = [2, 18], strides = [1, 1]} : vector<2x20xf32> to vector<2x18xf32>
    %20 = tpu.concatenate %17, %18, %19 in 0 : vector<2x18xf32>, vector<2x18xf32>, vector<2x18xf32> -> vector<6x18xf32>
    %cst_15 = arith.constant dense<0.000000e+00> : vector<4x18xf32>
    %21 = tpu.matmul %15, %20, %cst_15 {dimension_numbers = #tpu.dot_dimension_numbers<[1], [0], [0], [1], [0, 0, 1, 1], [], []>} : vector<4x6xf32>, vector<6x18xf32>, vector<4x18xf32> -> vector<4x18xf32>
    %c0_16 = arith.constant 0 : index
    %c4 = arith.constant 4 : index
    %c0_17 = arith.constant 0 : index
    %22 = vector.load %arg3[%c0_16, %c4, %c0_17] : memref<1x8x18xf32, #tpu.memory_space<vmem>>, vector<1x4x18xf32>
    %23 = vector.shape_cast %22 : vector<1x4x18xf32> to vector<4x18xf32>
    %24 = vector.shape_cast %21 : vector<4x18xf32> to vector<1x4x18xf32>
    tpu.vector_store %arg3[%c0_16, %c4, %c0_17], %24 {strides = array<i32>} : memref<1x8x18xf32, #tpu.memory_space<vmem>>, vector<1x4x18xf32>,
    return
  }
  func.func @transform_0(%arg0: i32) -> (i32, i32, i32) {
    %c0_i32 = arith.constant 0 : i32
    %c0_i32_0 = arith.constant 0 : i32
    %c0_i32_1 = arith.constant 0 : i32
    return %arg0, %c0_i32, %c0_i32_0 : i32, i32, i32
  }
  func.func @transform_1(%arg0: i32) -> (i32, i32, i32) {
    %c0_i32 = arith.constant 0 : i32
    %c0_i32_0 = arith.constant 0 : i32
    %c0_i32_1 = arith.constant 0 : i32
    %c0_i32_2 = arith.constant 0 : i32
    return %c0_i32, %c0_i32_0, %c0_i32_1 : i32, i32, i32
  }
  func.func @transform_2(%arg0: i32) -> (i32, i32, i32) {
    %c0_i32 = arith.constant 0 : i32
    %c0_i32_0 = arith.constant 0 : i32
    %c0_i32_1 = arith.constant 0 : i32
    return %arg0, %c0_i32, %c0_i32_0 : i32, i32, i32
  }
}

</mosaic_0001>

<bundles_post_ra>
// kernel: tpu_custom_call.1
= control target key start
LH: loop header
LB: loop body
LE: loop exit
PB: predicated region body
PF: predicated region fallthrough
CT: control target
= control target key end

     0   :  { %7 = vsyncpa [#allocation4], 0  ;;  %s731_s0 = inlined_call_operand.hbm [shape: f32[2,4,20], index: 0, kind: input, shape index: {}]   ;;  %s732_s1 = inlined_call_operand.hbm [shape: f32[2,4,6], index: 1, kind: input, shape index: {}]   ;;  %s733_s2 = inlined_call_operand.hbm [shape: f32[2,8,18], index: 2, kind: output, shape index: {}]  }
   0x1   :  { %9 = vsyncpa [#allocation4 + $0x1], 0 }
   0x2   :  { %10 = vsyncpa [#allocation7], 0 }
   0x3   :  { %11 = vsyncpa [#allocation5], 0 }
   0x4   :  { %13 = vsyncpa [#allocation5 + $0x1], 0  ;;  %s594_s9 = smov 0   ;;  %s596_s10 = smov 0  }
   0x5   :  { %s598_s11 = smov 0   ;;  %s600_s12 = smov 0  }
   0x6 LB: > { %s108_s15 = sshll.u32 %s732_s1, 4  ;;  %s618_s16 = sadd.s32 4294967295, %s572_s12   ;;  %s572_s12 = sphi %s600_s12, %s743_s12   ;;  %s568_s11 = sphi %s598_s11, %s742_s11   ;;  %s564_s10 = sphi %s596_s10, %s741_s10   ;;  %s560_s9 = sphi %s594_s9, %s740_s9   ;;  %s109_s15 = int_to_ptr.hbm [resolvable:$true] %s108_s15 }
   0x7   : > { %p364_p0 = scmp.ge.s32.totalorder %s572_s12, 1  ;;  %p40_p1 = scmp.eq.s32.totalorder %s618_s16, 0 }
   0x8   : > { %p97_p2 = scmp.lt.s32.totalorder %s572_s12, 3  ;;  %s574_s18 = smov [#allocation6]  }
   0x9   : > { %s110_s19 = sshll.u32 %s574_s18, 4  ;;  %s575_s20 = smov 64   ;;  %s111_s19 = int_to_ptr.vmem [resolvable:$true] %s110_s19 }
   0xa   : > { %p623_p3 = pnand %p364_p0, %p97_p2  ;;  %s576_s21 = smov 4  }
   0xb   : > { %s363_s22 = sadd.s32 4294967294, %s572_s12   ;;  %s634_s23 = sadd.s32 1, %s572_s12  }
   0xc   : > { %p389_p4 = pneg %p623_p3  ;;  %s26_s24 = sadd.s32 1, %s568_s11 }
   0xd   : > { %s23_s25 = ssub.s32 %s572_s12, %s634_s23  ;;  %p33_p7 = scmp.ne.s32.totalorder %s568_s11, %s564_s10 }
   0xe   : > { %p390_p6 = pnand %p389_p4, %p40_p1  ;;  %p24_p8 = scmp.eq.s32.totalorder %s23_s25, 0 }
   0xf   : > { %p34_p9 = scmp.eq.s32.totalorder %s572_s12, 0  ;;  %p39_p10 = scmp.ne.s32.totalorder %s564_s10, %s560_s9 }
  0x10   : > { %392 = dma.hbm_to_vmem [thread:$0]  (!%p390_p6), %s109_s15, 128, %s111_s19, [#allocation7], %s575_s20, %s575_s20, %s576_s21  }
  0x11   : > { %p84_p11 = scmp.eq.s32.totalorder %s618_s16, 1  ;;  %p650_p12 = por %p40_p1, %p39_p10 }
  0x12   : > { %s646_s26 = scalar_select %p24_p8, %s568_s11, %s26_s24  }
  0x13   : > { %p654_p13 = por %p84_p11, %p33_p7  ;;  %p90_p0 = scmp.eq.s32.totalorder %s363_s22, 1 }
  0x14   : > { %p35_p2 = por %p34_p9, %p33_p7  ;;  %s124_s29 = sand.u32 1, %s568_s11  }
  0x15   : > { %p659_p4 = por %p90_p0, %p39_p10  ;;  %p402_p6 = scmp.lt.s32.totalorder %s572_s12, 2 }
  0x16   : > { %s367_s3 = sshll.u32 %s124_s29, 2  ;;  %s368_s4 = sshll.u32 %s572_s12, 2 }
  0x17   : > { %s132_s7 = scalar_lea.hbm %s731_s0, %s368_s4  ;;  %s128_s13 = scalar_lea.vmem [#allocation3], %s367_s3 }
  0x18   : > { %s134_s8 = sshll.u32 %s132_s7, 4  ;;  %s136_s14 = sshll.u32 %s128_s13, 4  ;;  %s135_s8 = int_to_ptr.hbm [resolvable:$true] %s134_s8  ;;  %s137_s14 = int_to_ptr.vmem [resolvable:$true] %s136_s14 }
  0x19   : > { %p668_p8 = pnand %p402_p6, %p35_p2  ;;  %s125_s18 = scalar_lea.sflag [#allocation4], %s124_s29 }
  0x1a   : > { %s472_s19 = sshra.s32 %s135_s8, 4  ;;  %s479_s24 = scalar_lea.hbm %s731_s0, 8  ;;  %s473_s19 = int_to_ptr.hbm [resolvable:$true] %s472_s19 }
  0x1b   : > { %s474_s20 = scalar_lea.hbm %s473_s19, 4  ;;  %p476_p9 = pneg %p668_p8 }
  0x1c   : > { %p475_p7 = scmp.ne.s32.totalorder %s473_s19, %s474_s20  ;;  %p480_p0 = scmp.lt.s32.totalorder %s473_s19, %s731_s0 }
  0x1d   : > { %p481_p2 = scmp.lt.s32.totalorder %s479_s24, %s474_s20 }
  0x1e   : > { %p477_p10 = pnand %p476_p9, %p475_p7 }
  0x1f   : > { %p482_p6 = por %p481_p2, %p480_p0 }
  0x20   : > { %p478_p11 = pneg %p477_p10 }
  0x22   : > { %p483_p5 = pnand %p482_p6, %p478_p11 }
  0x24   : > { %486 = shalt.err (!%p483_p5)
}
  0x25   : > { %396 = dma.hbm_to_vmem [thread:$0]  (!%p668_p8), %s135_s8, 64, %s137_s14, %s125_s18  }
  0x26   : > { %145 = sbr.rel (%p623_p3) target bundleno = 312 (0x138), region = 28  ;;  %s685_s29 = sand.u32 (!%p623_p3), 1, %s564_s10  }
  0x27   : > { %s370_s4 = sshll.u32 (!%p623_p3), %s685_s29, 2  ;;  %s148_s5 = scalar_lea.sflag (!%p623_p3), [#allocation4], %s685_s29 }
  0x28   : > { %s151_s6 = scalar_lea.vmem (!%p623_p3), [#allocation3], %s370_s4 }
  0x2b   : > { %547 = dma.done.wait (%p650_p12), %s148_s5, 64  }
  0x2c   : > { %549 = vsyncadd (%p650_p12), %s148_s5, 4294967232 }
  0x2d   : > { %551 = dma.done.wait (%p40_p1), [#allocation7], 128  }
  0x2e   : > { %553 = vsyncadd (%p40_p1), [#allocation7], 4294967168  ;;  %vm179_vm0 = vcmask 158720   ;;  %v178_v0 = vld [vmem:[%s151_s6] sm:$0xf]  ;;  %s577_s17 = smov 127  }
  0x2f   : > { %180 = vst.msk [vmem:[#allocation2] sm:$0xf] %vm179_vm0, %v178_v0  ;;  %s578_s7 = smov 126   ;;  %vm192_vm1 = vcmask 1041408   ;;  %vm194_vm2 = vcmask 1043456   ;;  %vm200_vm3 = vcmask 1045504  }
  0x30   : > { %v181_v10 = vld [vmem:[#allocation6] sm:$0xf]  ;;  %vm196_vm4 = vcmask 48128   ;;  %v227_v15 = vld [vmem:[#allocation6 + $0x4] sm:$0xf]  ;;  %s372_s27 = sshll.u32 %s685_s29, 3 }
  0x31   : > { %vm224_vm5 = vcmask 142336   ;;  %s378_s8 = sshll.u32 %s618_s16, 3  ;;  %s177_s13 = scalar_lea.vmem [#allocation8], %s372_s27 }
  0x32   : > { %s278_s18 = scalar_lea.hbm %s733_s2, %s378_s8  ;;  %s280_s19 = sshll.u32 %s177_s13, 4  ;;  %s281_s19 = int_to_ptr.vmem [resolvable:$true] %s280_s19 }
  0x33   : > { %s282_s20 = sshll.u32 %s278_s18, 4  ;;  %s268_s21 = scalar_lea.sflag [#allocation5], %s685_s29  ;;  %s283_s20 = int_to_ptr.hbm [resolvable:$true] %s282_s20 }
  0x34   : > { %s516_s22 = sshra.s32 %s283_s20, 4  ;;  %s522_s3 = scalar_lea.hbm %s733_s2, 16  ;;  %s517_s22 = int_to_ptr.hbm [resolvable:$true] %s516_s22 }
  0x35   : > { %s518_s24 = scalar_lea.hbm %s517_s22, 8  ;;  %p523_p12 = scmp.lt.s32.totalorder %s517_s22, %s733_s2 }
  0x36   : > { %v182_v1 = vld [vmem:[#allocation2] sm:$0x3]  ;;  %v228_v4 = vld [vmem:[#allocation2 + $0x2] sm:$0x3]  ;;  %p519_p1 = scmp.ne.s32.totalorder %s517_s22, %s518_s24  ;;  %p524_p8 = scmp.lt.s32.totalorder %s522_s3, %s518_s24 }
  0x37   : > { %v184_v2 = vrot.slane %v182_v1, 6  ;;  %v188_v3 = vrot.slane %v182_v1, 4  ;;  %v230_v5 = vrot.slane %v228_v4, 6  ;;  %v234_v6 = vrot.slane %v228_v4, 4 }
  0x38   : > { %p520_p3 = pnand %p519_p1, %p654_p13  ;;  %p525_p7 = por %p524_p8, %p523_p12 }
  0x39   : > { %185 = vrot.lane.b32.xlu0 %v184_v2, %s577_s17  ;;  %189 = vrot.lane.b32.xlu1 %v188_v3, %s578_s7 }
  0x3a   : > { %p521_p5 = pneg %p520_p3 }
  0x3c   : > { %p526_p9 = pnand %p525_p7, %p521_p5 }
  0x41   : > { %231 = vrot.lane.b32.xlu0 %v230_v5, %s577_s17  ;;  %235 = vrot.lane.b32.xlu1 %v234_v6, %s578_s7 }
  0xab   : > { %v186_v7 = vpop.permute.xlu0 %185  ;;  %v190_v8 = vpop.permute.xlu1 %189 }
  0xac   : > { %v193_v9 = vsel %vm192_vm1, %v182_v1, %v186_v7 }
  0xad   : > { %v195_v11 = vsel %vm194_vm2, %v193_v9, %v190_v8 }
  0xae   : > { %373 = vmatpush.msk.msra.mxu0 %vm200_vm3, %v195_v11 }
  0xaf   : > { %374 = vmatmul.msk.f32.vlgmr.msra.gmra.mxu0 %vm196_vm4, %v181_v10 }
  0xb3   : > { %v232_v12 = vpop.permute.xlu0 %231  ;;  %v236_v13 = vpop.permute.xlu1 %235 }
  0xb4   : > { %v238_v14 = vsel %vm192_vm1, %v228_v4, %v232_v12 }
  0xb5   : > { %v239_v16 = vsel %vm194_vm2, %v238_v14, %v236_v13 }
  0xb6   : > { %375 = vmatpush.msk.msra.mxu1 %vm200_vm3, %v239_v16 }
  0xb7   : > { %376 = vmatmul.msk.f32.vlgmr.msra.gmra.mxu1 %vm196_vm4, %v227_v15 }
 0x12c   : > { %v221_v17 = vpop.f32.mrf.mxu0 }
 0x12d   : > { %225 = vst.msk [vmem:[%s177_s13] sm:$0xf] %vm224_vm5, %v221_v17 }
 0x134   : > { %v263_v18 = vpop.f32.mrf.mxu1 }
 0x135   : > { %266 = vst.msk [vmem:[%s177_s13 + $0x4] sm:$0xf] %vm224_vm5, %v263_v18 }
 0x136   : > { %529 = shalt.err (!%p526_p9)
}
 0x137   : > { %387 = dma.vmem_to_hbm [thread:$0]  (%p654_p13), %s281_s19, 128, %s283_s20, %s268_s21  }
 0x138 PF: > { %s294_s29 = sand.u32 1, %s560_s9   ;;  %p739_p10 = scmp.ge.s32.totalorder %s572_s12, 2 }
 0x139   : > { %s295_s6 = scalar_lea.sflag [#allocation5], %s294_s29 }
 0x13a   : > { %p398_p11 = pnand %p739_p10, %p659_p4 }
 0x13c   : > { %p399_p0 = pneg %p398_p11 }
 0x13e   : > { %555 = dma.done.wait (%p399_p0), %s295_s6, 128  }
 0x13f   : > { %557 = vsyncadd (%p399_p0), %s295_s6, 4294967168  ;;  %p16_p2 = scmp.ge.s32.totalorder %s634_s23, 4   ;;  %s740_s9 = smov %s564_s10 }
 0x140   : > { %s741_s10 = smov %s568_s11  ;;  %s742_s11 = smov %s646_s26 }
 0x141   : > { %s743_s12 = smov %s634_s23  ;;  %18 = sbr.rel (!%p16_p2) target bundleno = 6 (0x6), region = 78 }
 0x146   :  { %301 = vsyncpa [#allocation4], 1 }
 0x147   :  { %303 = vsyncpa [#allocation4 + $0x1], 1 }
 0x148   :  { %304 = vsyncpa [#allocation7], 1 }
 0x149   :  { %305 = vsyncpa [#allocation5], 1 }
 0x14a   :  { %307 = vsyncpa [#allocation5 + $0x1], 1 }

</bundles_post_ra>
